<compile_context>
chip_gen: v7x
topology: tpu7x:2x2x1
jax: 0.10.0
libtpu: 0.0.40
codegen_flags: <defaults>
</compile_context>

<pallas_src>
import jax
import jax.numpy as jnp
from jax.experimental import pallas as pl
from jax.experimental.pallas import tpu as pltpu


def _round_up(x, m):
    return ((x + m - 1) // m) * m


def _lora_kernel(x_ref, a_ref, b_ref, o_ref):
    # First MXU pass: (TM, in_dim_p) @ (in_dim_p, rank_p), f32 accumulation.
    xa = jnp.dot(x_ref[...], a_ref[...], preferred_element_type=jnp.float32)
    # Second MXU pass on the small intermediate (bf16 operands, f32 acc).
    xab = jnp.dot(xa.astype(b_ref.dtype), b_ref[...],
                  preferred_element_type=jnp.float32)
    # alpha is already folded into A by the wrapper; epilogue is just the cast.
    o_ref[...] = xab.astype(o_ref.dtype)


def lora_forward(x, A, B, alpha, *, block_m=512,
                 compute_dtype=jnp.bfloat16,
                 vmem_budget_bytes=24 * 1024 * 1024):
    """alpha * (x @ A @ B) with a batch-tiled, lane-padded Pallas kernel."""
    orig_shape = x.shape
    in_dim = orig_shape[-1]
    # Flatten any leading batch dims (matches PyTorch matmul broadcasting).
    x2 = x.reshape(-1, in_dim)
    batch = x2.shape[0]

    in_dim_a, rank = A.shape
    rank_b, out_dim = B.shape
    assert in_dim_a == in_dim and rank_b == rank

    out_dtype = x.dtype

    # Fold alpha into A once outside the kernel (exact for a scalar alpha;
    # avoids per-alpha recompiles and any in-kernel scalar work).
    a_eff = A.astype(jnp.float32) * jnp.asarray(alpha, jnp.float32)

    # Lane-dense padding: every last dim a multiple of 128.
    in_dim_p = _round_up(in_dim, 128)
    rank_p = _round_up(rank, 128)
    out_dim_p = _round_up(out_dim, 128)

    # Choose the batch tile so the double-buffered working set fits a VMEM
    # budget that is safe on v7x (64 MiB physical / 32 MiB default scoped).
    in_bpe = jnp.dtype(compute_dtype).itemsize
    out_bpe = jnp.dtype(out_dtype).itemsize

    def _fits(tm):
        need = (2 * tm * in_dim_p * in_bpe        # double-buffered x tiles
                + 2 * tm * out_dim_p * out_bpe    # double-buffered out tiles
                + in_dim_p * rank_p * in_bpe      # resident A
                + rank_p * out_dim_p * in_bpe     # resident B
                + tm * rank_p * 4                 # f32 intermediate xa
                + tm * out_dim_p * 4)             # f32 intermediate xab
        return need <= vmem_budget_bytes

    tm = max(8, _round_up(min(block_m, max(batch, 1)), 8))
    while tm > 8 and not _fits(tm):
        tm //= 2
    tm = max(8, _round_up(tm, 8))

    batch_p = _round_up(max(batch, 1), tm)

    # Zero-pad operands (exact w.r.t. the original math) and cast to bf16.
    x_p = jnp.zeros((batch_p, in_dim_p), compute_dtype)
    x_p = x_p.at[:batch, :in_dim].set(x2.astype(compute_dtype))
    a_p = jnp.zeros((in_dim_p, rank_p), compute_dtype)
    a_p = a_p.at[:in_dim, :rank].set(a_eff.astype(compute_dtype))
    b_p = jnp.zeros((rank_p, out_dim_p), compute_dtype)
    b_p = b_p.at[:rank, :out_dim].set(B.astype(compute_dtype))

    grid = (batch_p // tm,)

    # NOTE: for very large in_dim a K grid axis with a (TM, rank_p) f32
    # accumulator would bound VMEM further; unnecessary at LoRA-typical sizes.
    out_p = pl.pallas_call(
        _lora_kernel,
        out_shape=jax.ShapeDtypeStruct((batch_p, out_dim_p), out_dtype),
        grid_spec=pltpu.PrefetchScalarGridSpec(
            num_scalar_prefetch=0,
            grid=grid,
            in_specs=[
                pl.BlockSpec((tm, in_dim_p), lambda i: (i, 0)),       # x tiles
                pl.BlockSpec((in_dim_p, rank_p), lambda i: (0, 0)),   # A resident
                pl.BlockSpec((rank_p, out_dim_p), lambda i: (0, 0)),  # B resident
            ],
            out_specs=pl.BlockSpec((tm, out_dim_p), lambda i: (i, 0)),
        ),
        compiler_params=pltpu.CompilerParams(
            dimension_semantics=("parallel",),  # row tiles split across TCs (v7x)
        ),
    )(x_p, a_p, b_p)

    out = out_p[:batch, :out_dim]
    return out.reshape(orig_shape[:-1] + (out_dim,))


if __name__ == "__main__":
    # Small shapes consistent with the module: a linear LoRA adapter.
    batch, in_dim, out_dim, rank = 8, 32, 32, 4
    alpha = 16.0

    key = jax.random.PRNGKey(0)
    kx, ka, kb = jax.random.split(key, 3)

    # Deterministic parameter init mirroring the PyTorch __init__:
    #   A ~ randn(in_dim, rank) / sqrt(rank);  B = zeros(rank, out_dim)
    std_dev = 1.0 / jnp.sqrt(jnp.float32(rank))
    A = jax.random.normal(ka, (in_dim, rank), dtype=jnp.float32) * std_dev
    B = jnp.zeros((rank, out_dim), dtype=jnp.float32)

    x = jax.random.normal(kx, (batch, in_dim), dtype=jnp.float32)

    # 1) Faithful init (B == 0): output must be exactly zero.
    out0 = jax.block_until_ready(lora_forward(x, A, B, alpha))
    assert out0.shape == (batch, out_dim)
    assert jnp.allclose(out0, jnp.zeros_like(out0))

    # 2) Non-trivial B to actually exercise the matmul chain numerically.
    B_nz = jax.random.normal(kb, (rank, out_dim), dtype=jnp.float32)
    out = jax.block_until_ready(lora_forward(x, A, B_nz, alpha))
    ref = alpha * (x @ A @ B_nz)
    assert out.shape == (batch, out_dim)
    # bf16 operands / f32 accumulation -> loose tolerance vs. f32 reference.
    err = float(jnp.max(jnp.abs(out.astype(jnp.float32) - ref))
                / (jnp.max(jnp.abs(ref)) + 1e-6))
    assert err < 2e-2, f"relative error too large: {err}"

    print("KERNEL_OK")
</pallas_src>

<mosaic_0001>
module attributes {stable_mosaic.version = 11 : i64} {
  func.func @_lora_kernel(%arg0: i32, %arg1: memref<8x128xbf16, #tpu.memory_space<vmem>>, %arg2: memref<128x128xbf16, #tpu.memory_space<vmem>>, %arg3: memref<128x128xbf16, #tpu.memory_space<vmem>>, %arg4: memref<8x128xf32, #tpu.memory_space<vmem>>) attributes {dimension_semantics = [#tpu.dimension_semantics<parallel>], iteration_bounds = array<i64: 1>, scalar_prefetch = 0 : i64, scratch_operands = 0 : i64, tpu.core_type = #tpu.core_type<tc>, window_params = [{transform_indices = @transform_0, window_bounds = array<i64: 8, 128>}, {pipeline_mode = #tpu.pipeline_mode<synchronous>, transform_indices = @transform_1, window_bounds = array<i64: 128, 128>}, {pipeline_mode = #tpu.pipeline_mode<synchronous>, transform_indices = @transform_2, window_bounds = array<i64: 128, 128>}, {transform_indices = @transform_3, window_bounds = array<i64: 8, 128>}]} {
    %c0 = arith.constant 0 : index
    %c0_0 = arith.constant 0 : index
    %0 = vector.load %arg1[%c0, %c0_0] : memref<8x128xbf16, #tpu.memory_space<vmem>>, vector<8x128xbf16>
    %c0_1 = arith.constant 0 : index
    %c0_2 = arith.constant 0 : index
    %1 = vector.load %arg2[%c0_1, %c0_2] : memref<128x128xbf16, #tpu.memory_space<vmem>>, vector<128x128xbf16>
    %cst = arith.constant dense<0.000000e+00> : vector<8x128xf32>
    %2 = tpu.matmul %0, %1, %cst {dimension_numbers = #tpu.dot_dimension_numbers<[1], [0], [0], [1], [0, 0, 1, 1], [], []>} : vector<8x128xbf16>, vector<128x128xbf16>, vector<8x128xf32> -> vector<8x128xf32>
    %3 = arith.truncf %2 : vector<8x128xf32> to vector<8x128xbf16>
    %c0_3 = arith.constant 0 : index
    %c0_4 = arith.constant 0 : index
    %4 = vector.load %arg3[%c0_3, %c0_4] : memref<128x128xbf16, #tpu.memory_space<vmem>>, vector<128x128xbf16>
    %cst_5 = arith.constant dense<0.000000e+00> : vector<8x128xf32>
    %5 = tpu.matmul %3, %4, %cst_5 {dimension_numbers = #tpu.dot_dimension_numbers<[1], [0], [0], [1], [0, 0, 1, 1], [], []>} : vector<8x128xbf16>, vector<128x128xbf16>, vector<8x128xf32> -> vector<8x128xf32>
    %c0_6 = arith.constant 0 : index
    %c0_7 = arith.constant 0 : index
    %6 = vector.load %arg4[%c0_6, %c0_7] : memref<8x128xf32, #tpu.memory_space<vmem>>, vector<8x128xf32>
    tpu.vector_store %arg4[%c0_6, %c0_7], %5 {strides = array<i32>} : memref<8x128xf32, #tpu.memory_space<vmem>>, vector<8x128xf32>,
    return
  }
  func.func @transform_0(%arg0: i32) -> (i32, i32) {
    %c0_i32 = arith.constant 0 : i32
    %c0_i32_0 = arith.constant 0 : i32
    return %arg0, %c0_i32 : i32, i32
  }
  func.func @transform_1(%arg0: i32) -> (i32, i32) {
    %c0_i32 = arith.constant 0 : i32
    %c0_i32_0 = arith.constant 0 : i32
    %c0_i32_1 = arith.constant 0 : i32
    return %c0_i32, %c0_i32_0 : i32, i32
  }
  func.func @transform_2(%arg0: i32) -> (i32, i32) {
    %c0_i32 = arith.constant 0 : i32
    %c0_i32_0 = arith.constant 0 : i32
    %c0_i32_1 = arith.constant 0 : i32
    return %c0_i32, %c0_i32_0 : i32, i32
  }
  func.func @transform_3(%arg0: i32) -> (i32, i32) {
    %c0_i32 = arith.constant 0 : i32
    %c0_i32_0 = arith.constant 0 : i32
    return %arg0, %c0_i32 : i32, i32
  }
}

</mosaic_0001>

<bundles_post_ra>
// kernel: tpu_custom_call.1
= control target key start
LH: loop header
LB: loop body
LE: loop exit
PB: predicated region body
PF: predicated region fallthrough
CT: control target
= control target key end

     0   :  { %8 = vsyncpa [#allocation3], 0  ;;  %s556_s0 = inlined_call_operand.hbm [shape: bf16[8,128], index: 0, kind: input, shape index: {}]   ;;  %s557_s1 = inlined_call_operand.hbm [shape: bf16[128,128], index: 1, kind: input, shape index: {}]   ;;  %s558_s2 = inlined_call_operand.hbm [shape: bf16[128,128], index: 2, kind: input, shape index: {}]   ;;  %s559_s3 = inlined_call_operand.hbm [shape: f32[8,128], index: 3, kind: output, shape index: {}]  }
   0x1   :  { %9 = vsyncpa [#allocation6], 0 }
   0x2   :  { %10 = vsyncpa [#allocation4], 0  ;;  %s474_s12 = smov [#allocation5]   ;;  %s380_s16 = scalar_lea.hbm %s557_s1, 1024 }
   0x3   :  { %s26_s13 = sshll.u32 %s474_s12, 4  ;;  %p381_p0 = scmp.ne.s32.totalorder %s557_s1, %s380_s16  ;;  %s27_s13 = int_to_ptr.vmem [resolvable:$true] %s26_s13 }
   0x4   :  { %p384_p1 = scmp.lt.u32.totalorder %s380_s16, %s557_s1 }
   0x6   :  { %p386_p2 = pnand %p384_p1, %p381_p0 }
   0x8   :  { %389 = shalt.err (!%p386_p2)
}
   0x9   :  { %s390_s21 = scalar_lea.vmem %s27_s13, 1024  ;;  %p395_p4 = scmp.lt.s32.totalorder %s27_s13, %s27_s13 }
   0xa   :  { %p391_p3 = scmp.ne.s32.totalorder %s27_s13, %s390_s21  ;;  %p396_p5 = scmp.lt.s32.totalorder %s390_s21, %s390_s21 }
   0xc   :  { %p397_p6 = por %p396_p5, %p395_p4 }
   0xe   :  { %p398_p7 = pnand %p397_p6, %p391_p3 }
  0x10   :  { %401 = shalt.err (!%p398_p7)
}
  0x11   :  { %s475_s22 = smov 64   ;;  %s476_s23 = smov 4  }
  0x12   :  { %32 = dma.hbm_to_vmem [thread:$0]  %s557_s1, 1024, %s27_s13, [#allocation6], %s475_s22, %s475_s22, %s476_s23  }
  0x13   :  { %s477_s26 = smov [#allocation2]   ;;  %s478_s28 = smov [#allocation7]  }
  0x14   :  { %s17_s27 = sshll.u32 %s477_s26, 4  ;;  %s38_s29 = sshll.u32 %s478_s28, 4  ;;  %s18_s27 = int_to_ptr.vmem [resolvable:$true] %s17_s27  ;;  %s39_s29 = int_to_ptr.vmem [resolvable:$true] %s38_s29 }
  0x15   :  { %s402_s5 = scalar_lea.hbm %s556_s0, 64 }
  0x16   :  { %p403_p8 = scmp.ne.s32.totalorder %s556_s0, %s402_s5  ;;  %p406_p9 = scmp.lt.u32.totalorder %s402_s5, %s556_s0 }
  0x18   :  { %p408_p10 = pnand %p406_p9, %p403_p8 }
  0x1a   :  { %411 = shalt.err (!%p408_p10)
}
  0x1b   :  { %s412_s1 = scalar_lea.vmem %s18_s27, 64  ;;  %p417_p12 = scmp.lt.s32.totalorder %s18_s27, %s18_s27 }
  0x1c   :  { %p413_p11 = scmp.ne.s32.totalorder %s18_s27, %s412_s1  ;;  %p418_p13 = scmp.lt.s32.totalorder %s412_s1, %s412_s1 }
  0x1e   :  { %p419_p0 = por %p418_p13, %p417_p12 }
  0x20   :  { %p420_p1 = pnand %p419_p0, %p413_p11 }
  0x22   :  { %423 = shalt.err (!%p420_p1)
}
  0x23   :  { %20 = dma.hbm_to_vmem [thread:$0]  %s556_s0, 64, %s18_s27, [#allocation3]  }
  0x24   :  { %s424_s14 = scalar_lea.hbm %s558_s2, 1024 }
  0x25   :  { %p425_p2 = scmp.ne.s32.totalorder %s558_s2, %s424_s14  ;;  %p428_p3 = scmp.lt.u32.totalorder %s424_s14, %s558_s2 }
  0x27   :  { %p430_p4 = pnand %p428_p3, %p425_p2 }
  0x29   :  { %433 = shalt.err (!%p430_p4)
}
  0x2a   :  { %s434_s19 = scalar_lea.vmem %s39_s29, 1024  ;;  %p439_p6 = scmp.lt.s32.totalorder %s39_s29, %s39_s29 }
  0x2b   :  { %p435_p5 = scmp.ne.s32.totalorder %s39_s29, %s434_s19  ;;  %p440_p7 = scmp.lt.s32.totalorder %s434_s19, %s434_s19 }
  0x2d   :  { %p441_p8 = por %p440_p7, %p439_p6 }
  0x2f   :  { %p442_p9 = pnand %p441_p8, %p435_p5 }
  0x31   :  { %445 = shalt.err (!%p442_p9)
}
  0x32   :  { %44 = dma.hbm_to_vmem [thread:$0]  %s558_s2, 1024, %s39_s29, [#allocation6], %s475_s22, %s475_s22, %s476_s23  }
  0x33   :  { %468 = dma.done.wait [#allocation3], 64  }
  0x34   :  { %469 = vsyncadd [#allocation3], 4294967232 }
  0x35   :  { %470 = dma.done.wait [#allocation6], 2048  }
  0x36   :  { %471 = vsyncadd [#allocation6], 4294965248  ;;  %v479_v0 = vmov 0.0   ;;  %vm480_vm0 = vmmov 0   ;;  %v364_v1 = vld [vmem:[#allocation5] sm:$0xff]   ;;  %v365_v2 = vld [vmem:[#allocation5 + $0x8] sm:$0xff]  }
  0x37   :  { %316 = vmatprep.subr.bf16.mxu0 %v479_v0  ;;  %332 = vmatprep.mubr.msk.bf16.mxu0 %vm480_vm0, %v479_v0  ;;  %v366_v3 = vld [vmem:[#allocation5 + $0x10] sm:$0xff]   ;;  %v372_v4 = vld [vmem:[#allocation7] sm:$0xff]   ;;  %v367_v5 = vld [vmem:[#allocation5 + $0x18] sm:$0xff]   ;;  %s481_s2 = smov [#allocation8]  }
  0x38   :  { %336 = vmatprep.subr.bf16.mxu1 %v479_v0  ;;  %352 = vmatprep.mubr.msk.bf16.mxu1 %vm480_vm0, %v479_v0  ;;  %v373_v6 = vld [vmem:[#allocation7 + $0x8] sm:$0xff]   ;;  %v368_v7 = vld [vmem:[#allocation5 + $0x20] sm:$0xff]   ;;  %v374_v8 = vld [vmem:[#allocation7 + $0x10] sm:$0xff]   ;;  %s272_s21 = sshll.u32 %s481_s2, 4  ;;  %s273_s21 = int_to_ptr.vmem [resolvable:$true] %s272_s21 }
  0x39   :  { %317 = vmatpush3.bf16.msra.mxu0 %v364_v1  ;;  %337 = vmatpush3.bf16.msra.mxu1 %v372_v4  ;;  %v369_v9 = vld [vmem:[#allocation5 + $0x28] sm:$0xff]   ;;  %v375_v10 = vld [vmem:[#allocation7 + $0x18] sm:$0xff]   ;;  %v370_v11 = vld [vmem:[#allocation5 + $0x30] sm:$0xff]   ;;  %s446_s22 = scalar_lea.vmem %s273_s21, 128  ;;  %p451_p11 = scmp.lt.s32.totalorder %s273_s21, %s273_s21 }
  0x3a   :  { %318 = vmatprep.subr.bf16.mxu0 %v479_v0  ;;  %338 = vmatprep.subr.bf16.mxu1 %v479_v0  ;;  %v376_v12 = vld [vmem:[#allocation7 + $0x20] sm:$0xff]   ;;  %v371_v13 = vld [vmem:[#allocation5 + $0x38] sm:$0xff]   ;;  %v377_v14 = vld [vmem:[#allocation7 + $0x28] sm:$0xff]   ;;  %p447_p10 = scmp.ne.s32.totalorder %s273_s21, %s446_s22  ;;  %p452_p12 = scmp.lt.s32.totalorder %s446_s22, %s446_s22 }
  0x3b   :  { %v55_v15 = vld [vmem:[#allocation2] sm:$0xf]  ;;  %v378_v16 = vld [vmem:[#allocation7 + $0x30] sm:$0xff]  }
  0x3c   :  { %v379_v17 = vld [vmem:[#allocation7 + $0x38] sm:$0xff]   ;;  %p453_p13 = por %p452_p12, %p451_p11 }
  0x3d   :  { %319 = vmatpush3.bf16.msra.mxu0 %v365_v2  ;;  %339 = vmatpush3.bf16.msra.mxu1 %v373_v6 }
  0x3e   :  { %320 = vmatprep.subr.bf16.mxu0 %v479_v0  ;;  %340 = vmatprep.subr.bf16.mxu1 %v479_v0  ;;  %p454_p0 = pnand %p453_p13, %p447_p10 }
  0x41   :  { %321 = vmatpush3.bf16.msra.mxu0 %v366_v3  ;;  %341 = vmatpush3.bf16.msra.mxu1 %v374_v8 }
  0x42   :  { %322 = vmatprep.subr.bf16.mxu0 %v479_v0  ;;  %342 = vmatprep.subr.bf16.mxu1 %v479_v0 }
  0x45   :  { %323 = vmatpush3.bf16.msra.mxu0 %v367_v5  ;;  %343 = vmatpush3.bf16.msra.mxu1 %v375_v10 }
  0x46   :  { %324 = vmatprep.subr.bf16.mxu0 %v479_v0  ;;  %344 = vmatprep.subr.bf16.mxu1 %v479_v0 }
  0x49   :  { %325 = vmatpush3.bf16.msra.mxu0 %v368_v7  ;;  %345 = vmatpush3.bf16.msra.mxu1 %v376_v12 }
  0x4a   :  { %326 = vmatprep.subr.bf16.mxu0 %v479_v0  ;;  %346 = vmatprep.subr.bf16.mxu1 %v479_v0 }
  0x4d   :  { %327 = vmatpush3.bf16.msra.mxu0 %v369_v9  ;;  %347 = vmatpush3.bf16.msra.mxu1 %v377_v14 }
  0x4e   :  { %328 = vmatprep.subr.bf16.mxu0 %v479_v0  ;;  %348 = vmatprep.subr.bf16.mxu1 %v479_v0 }
  0x51   :  { %329 = vmatpush3.bf16.msra.mxu0 %v370_v11  ;;  %349 = vmatpush3.bf16.msra.mxu1 %v378_v16 }
  0x52   :  { %330 = vmatprep.subr.bf16.mxu0 %v479_v0  ;;  %350 = vmatprep.subr.bf16.mxu1 %v479_v0 }
  0x55   :  { %331 = vmatpush3.bf16.msra.mxu0 %v371_v13  ;;  %351 = vmatpush3.bf16.msra.mxu1 %v379_v17 }
  0x58   :  { %333 = vmatmul.mubr.bf16.vlgmr.msra.gmra.mrb[0].mxu0 %v55_v15 }
 0x12b   :  { %v154_v18 = vpop.f32.mrb[0].mxu0 }
 0x12c   :  { %v160_v19 = vpack.c.bf16 %v154_v18, %v154_v18  ;;  %v334_v20 = vpop.f32.mrb[1].mxu0 }
 0x12d   :  { %v157_v21 = vpop.f32.mrb[2].mxu0 }
 0x12e   :  { %v335_v22 = vpop.f32.mrb[3].mxu0  ;;  %353 = vmatmul.mubr.bf16.vlgmr.msra.gmra.mrb[0].mxu1 %v160_v19 }
 0x201   :  { %v259_v23 = vpop.f32.mrb[0].mxu1 }
 0x202   :  { %265 = vst [vmem:[#allocation8] sm:$0xff] %v259_v23  ;;  %v354_v24 = vpop.f32.mrb[1].mxu1 }
 0x203   :  { %v262_v25 = vpop.f32.mrb[2].mxu1 }
 0x204   :  { %457 = shalt.err (!%p454_p0)
}
 0x205   :  { %s458_s25 = scalar_lea.hbm %s559_s3, 128 }
 0x206   :  { %p459_p1 = scmp.ne.s32.totalorder %s559_s3, %s458_s25  ;;  %p462_p2 = scmp.lt.u32.totalorder %s458_s25, %s559_s3 }
 0x208   :  { %p464_p3 = pnand %p462_p2, %p459_p1 }
 0x20a   :  { %467 = shalt.err (!%p464_p3)
}
 0x20b   :  { %275 = dma.vmem_to_hbm [thread:$0]  %s273_s21, 128, %s559_s3, [#allocation4]   ;;  %v355_v26 = vpop.f32.mrb[3].mxu1 }
 0x20c   :  { %472 = dma.done.wait [#allocation4], 128  }
 0x20d   :  { %473 = vsyncadd [#allocation4], 4294967168 }
 0x20e   :  { %279 = vsyncpa [#allocation3], 1 }
 0x20f   :  { %280 = vsyncpa [#allocation6], 1 }
 0x210   :  { %281 = vsyncpa [#allocation4], 1 }

</bundles_post_ra>
